<compile_context>
chip_gen: v7x
topology: tpu7x:2x2x1
jax: 0.10.0
libtpu: 0.0.40
codegen_flags: <defaults>
</compile_context>

<pallas_src>
import math
import functools

import jax
import jax.numpy as jnp
from jax import lax
from jax.experimental import pallas as pl
from jax.experimental.pallas import tpu as pltpu


# ---------------------------------------------------------------------------
# Elementwise GELU
# ---------------------------------------------------------------------------
def _gelu(x, approx):
    if approx:
        # tanh approximation -> EUP slot, overlaps with MXU/VALU work.
        c = math.sqrt(2.0 / math.pi)
        return 0.5 * x * (1.0 + jnp.tanh(c * (x + 0.044715 * x * x * x)))
    # nn.GELU() default (approximate='none') -> exact erf-based GELU.
    return 0.5 * x * (1.0 + lax.erf(x * (1.0 / math.sqrt(2.0))))


# ---------------------------------------------------------------------------
# Kernel A: fully-resident weights (1-D grid over row tiles)
# ---------------------------------------------------------------------------
def mlp_resident_kernel(x_ref, w_fc_ref, b_fc_ref, w_proj_ref, b_proj_ref,
                        o_ref, *, gelu_approx):
    fc = jnp.dot(x_ref[...], w_fc_ref[...],
                 preferred_element_type=jnp.float32) + b_fc_ref[...]
    fc = _gelu(fc, gelu_approx).astype(w_proj_ref.dtype)
    out = jnp.dot(fc, w_proj_ref[...],
                  preferred_element_type=jnp.float32) + b_proj_ref[...]
    o_ref[...] = out.astype(o_ref.dtype)


# ---------------------------------------------------------------------------
# Kernel B: hidden dimension streamed in (C,TH)/(TH,C) tiles, f32 accumulator
# ---------------------------------------------------------------------------
def mlp_tiled_kernel(x_ref, w_fc_ref, b_fc_ref, w_proj_ref, b_proj_ref,
                     o_ref, acc_ref, *, gelu_approx):
    h = pl.program_id(1)

    @pl.when(h == 0)
    def _():
        # Initialize with the broadcast output bias (saves the finalize add).
        acc_ref[...] = jnp.broadcast_to(
            b_proj_ref[...].astype(jnp.float32), acc_ref.shape)

    fc = jnp.dot(x_ref[...], w_fc_ref[...],
                 preferred_element_type=jnp.float32) + b_fc_ref[...]
    fc = _gelu(fc, gelu_approx).astype(w_proj_ref.dtype)
    acc_ref[...] += jnp.dot(fc, w_proj_ref[...],
                            preferred_element_type=jnp.float32)

    @pl.when(h == pl.num_programs(1) - 1)
    def _():
        o_ref[...] = acc_ref[...].astype(o_ref.dtype)


# ---------------------------------------------------------------------------
# Tiling helpers
# ---------------------------------------------------------------------------
def _round_up(n, m):
    return ((n + m - 1) // m) * m


def _pick_row_tile(M, row_tile):
    """Pick TM (multiple of 8, preferably of 256) dividing the 8-padded row
    count, capped at `row_tile`, leaving >= 2 parallel steps when possible."""
    M8 = _round_up(M, 8)
    tm_cap = min(row_tile, M8)
    best = 8
    for step in (256, 8):
        cand = 0
        t = step
        while t <= tm_cap:
            if M8 % t == 0:
                cand = t
            t += step
        if cand:
            best = cand
            break
    # Keep >= 2 steps on the parallel axis so both v7x TensorCores get work.
    if M8 // best < 2:
        half = M8 // 2
        if half >= 8 and half % 8 == 0:
            best = half
    return best, M8


def _pick_hidden_tile(H):
    # Wide, 128-aligned hidden tiles (MXU / lane friendly).
    for th in (1024, 512, 256, 128):
        if H % th == 0:
            return th
    return H  # tiny / unaligned toy sizes: single full-width tile


def _vmem_capacity_bytes():
    try:
        return int(pltpu.get_tpu_info().vmem_capacity_bytes)
    except Exception:
        return 64 * 1024 * 1024  # conservative (v7x per-TC VMEM)


def _resident_fits(TM, C, H, wbytes, xbytes, obytes, vmem_cap):
    # Conservative estimate: weights possibly double-buffered, double-buffered
    # x/out row tiles, f32 (TM, H) GELU intermediate plus slack.
    weights = (C * H + H * C) * wbytes + (H + C) * 4
    need = (2 * weights
            + 2 * TM * C * xbytes
            + 2 * TM * C * obytes
            + TM * H * 4
            + TM * C * 4)
    return need <= int(0.55 * vmem_cap)


# ---------------------------------------------------------------------------
# Wrapper
# ---------------------------------------------------------------------------
def mlp_forward(x, params, *, row_tile=1024, use_bf16=True, gelu_approx=False,
                resident=None, weight_buffers=2):
    """x: (B, T, C); params: (w_fc (C,4C), b_fc (4C,), w_proj (4C,C), b_proj (C,))."""
    w_fc, b_fc, w_proj, b_proj = params
    B, T, C = x.shape
    H = w_fc.shape[1]
    assert w_fc.shape == (C, H) and w_proj.shape == (H, C)
    assert b_fc.shape == (H,) and b_proj.shape == (C,)

    out_dtype = x.dtype
    compute_dtype = jnp.bfloat16 if use_bf16 else x.dtype

    # Flatten rows; TM is chosen to divide the 8-padded row count (pad <= 7).
    M = B * T
    x2 = x.reshape(M, C)
    TM, Mp = _pick_row_tile(M, row_tile)
    if Mp != M:
        x2 = jnp.pad(x2, ((0, Mp - M), (0, 0)))

    # Cast ONCE outside the kernel: bf16 weight/activation DMA, f32 biases.
    x2 = x2.astype(compute_dtype)
    w_fc_c = w_fc.astype(compute_dtype)
    w_proj_c = w_proj.astype(compute_dtype)
    b_fc2 = b_fc.reshape(1, H).astype(jnp.float32)
    b_proj2 = b_proj.reshape(1, C).astype(jnp.float32)

    vmem_cap = _vmem_capacity_bytes()
    vmem_limit = min(int(0.80 * vmem_cap), 100 * 1024 * 1024)

    wbytes = jnp.dtype(compute_dtype).itemsize
    obytes = jnp.dtype(out_dtype).itemsize
    if resident is None:
        resident = _resident_fits(TM, C, H, wbytes, wbytes, obytes, vmem_cap)

    if resident:
        # ------------------------------------------------------------------
        # Resident-weight variant: weights DMA'd once, 1-D parallel grid.
        # ------------------------------------------------------------------
        kernel = functools.partial(mlp_resident_kernel, gelu_approx=gelu_approx)
        out = pl.pallas_call(
            kernel,
            out_shape=jax.ShapeDtypeStruct((Mp, C), out_dtype),
            grid_spec=pltpu.PrefetchScalarGridSpec(
                num_scalar_prefetch=0,
                grid=(Mp // TM,),
                in_specs=[
                    pl.BlockSpec((TM, C), lambda i: (i, 0)),   # x row tile
                    pl.BlockSpec((C, H), lambda i: (0, 0)),    # w_fc (resident)
                    pl.BlockSpec((1, H), lambda i: (0, 0)),    # b_fc (resident)
                    pl.BlockSpec((H, C), lambda i: (0, 0)),    # w_proj (resident)
                    pl.BlockSpec((1, C), lambda i: (0, 0)),    # b_proj (resident)
                ],
                out_specs=pl.BlockSpec((TM, C), lambda i: (i, 0)),
            ),
            compiler_params=pltpu.CompilerParams(
                dimension_semantics=("parallel",),
                vmem_limit_bytes=vmem_limit,
            ),
        )(x2, w_fc_c, b_fc2, w_proj_c, b_proj2)
    else:
        # ------------------------------------------------------------------
        # Hidden-tiled variant (bounded VMEM, e.g. v7x or very wide models).
        # ------------------------------------------------------------------
        TH = _pick_hidden_tile(H)
        wkw = {}
        if weight_buffers > 2:
            wkw = dict(pipeline_mode=pl.Buffered(weight_buffers))
        kernel = functools.partial(mlp_tiled_kernel, gelu_approx=gelu_approx)
        out = pl.pallas_call(
            kernel,
            out_shape=jax.ShapeDtypeStruct((Mp, C), out_dtype),
            grid_spec=pltpu.PrefetchScalarGridSpec(
                num_scalar_prefetch=0,
                grid=(Mp // TM, H // TH),
                in_specs=[
                    pl.BlockSpec((TM, C), lambda i, h: (i, 0)),        # x row tile
                    pl.BlockSpec((C, TH), lambda i, h: (0, h), **wkw),  # w_fc col tile
                    pl.BlockSpec((1, TH), lambda i, h: (0, h)),         # b_fc tile
                    pl.BlockSpec((TH, C), lambda i, h: (h, 0), **wkw),  # w_proj row tile
                    pl.BlockSpec((1, C), lambda i, h: (0, 0)),          # b_proj
                ],
                out_specs=pl.BlockSpec((TM, C), lambda i, h: (i, 0)),
                scratch_shapes=[pltpu.VMEM((TM, C), jnp.float32)],
            ),
            compiler_params=pltpu.CompilerParams(
                dimension_semantics=("parallel", "arbitrary"),
                vmem_limit_bytes=vmem_limit,
            ),
        )(x2, w_fc_c, b_fc2, w_proj_c, b_proj2)

    return out[:M].reshape(B, T, C)


# ---------------------------------------------------------------------------
# Params / reference
# ---------------------------------------------------------------------------
def init_params(key, n_embd):
    k1, k2, k3, k4 = jax.random.split(key, 4)
    s = 0.02
    H = 4 * n_embd
    w_fc = s * jax.random.normal(k1, (n_embd, H), jnp.float32)
    b_fc = s * jax.random.normal(k2, (H,), jnp.float32)
    w_proj = s * jax.random.normal(k3, (H, n_embd), jnp.float32)
    b_proj = s * jax.random.normal(k4, (n_embd,), jnp.float32)
    return (w_fc, b_fc, w_proj, b_proj)


def mlp_reference(x, params):
    """Pure-JAX reference matching PyTorch MLP.forward (exact GELU)."""
    w_fc, b_fc, w_proj, b_proj = params
    fc = x @ w_fc + b_fc
    fc = 0.5 * fc * (1.0 + lax.erf(fc / math.sqrt(2.0)))
    return fc @ w_proj + b_proj


if __name__ == "__main__":
    B, T, n_embd = 2, 8, 32   # hidden = 4 * n_embd = 128

    key = jax.random.PRNGKey(0)
    kx, kp = jax.random.split(key)
    x = jax.random.normal(kx, (B, T, n_embd), jnp.float32)
    params = init_params(kp, n_embd)

    ref = mlp_reference(x, params)

    # f32 MXU-operand path (closest to PyTorch f32 semantics).
    out_f32 = jax.block_until_ready(mlp_forward(x, params, use_bf16=False))
    assert out_f32.shape == (B, T, n_embd)
    assert jnp.allclose(out_f32, ref, atol=1e-4, rtol=1e-4), "f32 mismatch vs reference"

    # Default path: bf16 operands (wrapper-cast), f32 accumulate, resident weights.
    out_bf16 = jax.block_until_ready(mlp_forward(x, params))
    assert jnp.allclose(out_bf16, ref, atol=2e-2, rtol=2e-2), "bf16 mismatch vs reference"

    # Force the hidden-tiled (streamed-weight) kernel for coverage (v7x path).
    out_tiled = jax.block_until_ready(mlp_forward(x, params, resident=False))
    assert jnp.allclose(out_tiled, ref, atol=2e-2, rtol=2e-2), "tiled mismatch vs reference"

    print("KERNEL_OK")
</pallas_src>

<mosaic_0001>
module attributes {stable_mosaic.version = 11 : i64} {
  func.func @mlp_resident_kernel(%arg0: i32, %arg1: memref<8x32xf32, #tpu.memory_space<vmem>>, %arg2: memref<32x128xf32, #tpu.memory_space<vmem>>, %arg3: memref<1x128xf32, #tpu.memory_space<vmem>>, %arg4: memref<128x32xf32, #tpu.memory_space<vmem>>, %arg5: memref<1x32xf32, #tpu.memory_space<vmem>>, %arg6: memref<8x32xf32, #tpu.memory_space<vmem>>) attributes {dimension_semantics = [#tpu.dimension_semantics<parallel>], iteration_bounds = array<i64: 2>, scalar_prefetch = 0 : i64, scratch_operands = 0 : i64, tpu.core_type = #tpu.core_type<tc>, window_params = [{transform_indices = @transform_0, window_bounds = array<i64: 8, 32>}, {pipeline_mode = #tpu.pipeline_mode<synchronous>, transform_indices = @transform_1, window_bounds = array<i64: 32, 128>}, {pipeline_mode = #tpu.pipeline_mode<synchronous>, transform_indices = @transform_2, window_bounds = array<i64: 1, 128>}, {pipeline_mode = #tpu.pipeline_mode<synchronous>, transform_indices = @transform_3, window_bounds = array<i64: 128, 32>}, {pipeline_mode = #tpu.pipeline_mode<synchronous>, transform_indices = @transform_4, window_bounds = array<i64: 1, 32>}, {transform_indices = @transform_5, window_bounds = array<i64: 8, 32>}]} {
    %c0 = arith.constant 0 : index
    %c0_0 = arith.constant 0 : index
    %0 = vector.load %arg1[%c0, %c0_0] : memref<8x32xf32, #tpu.memory_space<vmem>>, vector<8x32xf32>
    %c0_1 = arith.constant 0 : index
    %c0_2 = arith.constant 0 : index
    %1 = vector.load %arg2[%c0_1, %c0_2] : memref<32x128xf32, #tpu.memory_space<vmem>>, vector<32x128xf32>
    %cst = arith.constant dense<0.000000e+00> : vector<8x128xf32>
    %2 = tpu.matmul %0, %1, %cst {dimension_numbers = #tpu.dot_dimension_numbers<[1], [0], [0], [1], [0, 0, 1, 1], [], []>} : vector<8x32xf32>, vector<32x128xf32>, vector<8x128xf32> -> vector<8x128xf32>
    %c0_3 = arith.constant 0 : index
    %c0_4 = arith.constant 0 : index
    %3 = vector.load %arg3[%c0_3, %c0_4] : memref<1x128xf32, #tpu.memory_space<vmem>>, vector<1x128xf32>
    %4 = vector.broadcast %3 : vector<1x128xf32> to vector<8x128xf32>
    %5 = arith.addf %2, %4 : vector<8x128xf32>
    %cst_5 = arith.constant 5.000000e-01 : f32
    %6 = vector.broadcast %cst_5 : f32 to vector<8x128xf32>
    %7 = arith.mulf %6, %5 : vector<8x128xf32>
    %cst_6 = arith.constant 0.707106769 : f32
    %8 = vector.broadcast %cst_6 : f32 to vector<8x128xf32>
    %9 = arith.mulf %5, %8 : vector<8x128xf32>
    %10 = math.erf %9 : vector<8x128xf32>
    %cst_7 = arith.constant 1.000000e+00 : f32
    %11 = vector.broadcast %cst_7 : f32 to vector<8x128xf32>
    %12 = arith.addf %11, %10 : vector<8x128xf32>
    %13 = arith.mulf %7, %12 : vector<8x128xf32>
    %c0_8 = arith.constant 0 : index
    %c0_9 = arith.constant 0 : index
    %14 = vector.load %arg4[%c0_8, %c0_9] : memref<128x32xf32, #tpu.memory_space<vmem>>, vector<128x32xf32>
    %cst_10 = arith.constant dense<0.000000e+00> : vector<8x32xf32>
    %15 = tpu.matmul %13, %14, %cst_10 {dimension_numbers = #tpu.dot_dimension_numbers<[1], [0], [0], [1], [0, 0, 1, 1], [], []>} : vector<8x128xf32>, vector<128x32xf32>, vector<8x32xf32> -> vector<8x32xf32>
    %c0_11 = arith.constant 0 : index
    %c0_12 = arith.constant 0 : index
    %16 = vector.load %arg5[%c0_11, %c0_12] : memref<1x32xf32, #tpu.memory_space<vmem>>, vector<1x32xf32>
    %17 = vector.broadcast %16 : vector<1x32xf32> to vector<8x32xf32>
    %18 = arith.addf %15, %17 : vector<8x32xf32>
    %c0_13 = arith.constant 0 : index
    %c0_14 = arith.constant 0 : index
    %19 = vector.load %arg6[%c0_13, %c0_14] : memref<8x32xf32, #tpu.memory_space<vmem>>, vector<8x32xf32>
    tpu.vector_store %arg6[%c0_13, %c0_14], %18 {strides = array<i32>} : memref<8x32xf32, #tpu.memory_space<vmem>>, vector<8x32xf32>,
    return
  }
  func.func @transform_0(%arg0: i32) -> (i32, i32) {
    %c0_i32 = arith.constant 0 : i32
    %c0_i32_0 = arith.constant 0 : i32
    return %arg0, %c0_i32 : i32, i32
  }
  func.func @transform_1(%arg0: i32) -> (i32, i32) {
    %c0_i32 = arith.constant 0 : i32
    %c0_i32_0 = arith.constant 0 : i32
    %c0_i32_1 = arith.constant 0 : i32
    return %c0_i32, %c0_i32_0 : i32, i32
  }
  func.func @transform_2(%arg0: i32) -> (i32, i32) {
    %c0_i32 = arith.constant 0 : i32
    %c0_i32_0 = arith.constant 0 : i32
    %c0_i32_1 = arith.constant 0 : i32
    return %c0_i32, %c0_i32_0 : i32, i32
  }
  func.func @transform_3(%arg0: i32) -> (i32, i32) {
    %c0_i32 = arith.constant 0 : i32
    %c0_i32_0 = arith.constant 0 : i32
    %c0_i32_1 = arith.constant 0 : i32
    return %c0_i32, %c0_i32_0 : i32, i32
  }
  func.func @transform_4(%arg0: i32) -> (i32, i32) {
    %c0_i32 = arith.constant 0 : i32
    %c0_i32_0 = arith.constant 0 : i32
    %c0_i32_1 = arith.constant 0 : i32
    return %c0_i32, %c0_i32_0 : i32, i32
  }
  func.func @transform_5(%arg0: i32) -> (i32, i32) {
    %c0_i32 = arith.constant 0 : i32
    %c0_i32_0 = arith.constant 0 : i32
    return %arg0, %c0_i32 : i32, i32
  }
}

</mosaic_0001>

<bundles_post_ra>
// kernel: tpu_custom_call.1
= control target key start
LH: loop header
LB: loop body
LE: loop exit
PB: predicated region body
PF: predicated region fallthrough
CT: control target
= control target key end

     0   :  { %10 = vsyncpa [#allocation3], 0  ;;  %s899_s0 = inlined_call_operand.vmem [shape: f32[16,32], index: 0, kind: input, shape index: {}]   ;;  %s900_s1 = inlined_call_operand.vmem [shape: f32[32,128], index: 1, kind: input, shape index: {}]   ;;  %s901_s2 = inlined_call_operand.vmem [shape: f32[1,128], index: 2, kind: input, shape index: {}]   ;;  %s902_s3 = inlined_call_operand.vmem [shape: f32[128,32], index: 3, kind: input, shape index: {}]   ;;  %s903_s4 = inlined_call_operand.vmem [shape: f32[1,32], index: 4, kind: input, shape index: {}]   ;;  %s904_s5 = inlined_call_operand.hbm [shape: f32[16,32], index: 5, kind: output, shape index: {}]  }
   0x1   :  { %12 = vsyncpa [#allocation3 + $0x1], 0  ;;  %s731_s18 = smov 0   ;;  %s733_s19 = smov 0  }
   0x2   :  { %s735_s20 = smov 0   ;;  %s737_s21 = smov 0  }
   0x3 LB: > { %s752_s22 = sadd.s32 4294967295, %s695_s21   ;;  %s478_s23 = sadd.s32 4294967294, %s695_s21   ;;  %s695_s21 = sphi %s737_s21, %s910_s21   ;;  %s691_s20 = sphi %s735_s20, %s909_s20   ;;  %s687_s19 = sphi %s733_s19, %s908_s19   ;;  %s683_s18 = sphi %s731_s18, %s907_s18  }
   0x4   : > { %s756_s24 = sadd.s32 1, %s695_s21   ;;  %s135_s25 = sadd.s32 1, %s691_s20 }
   0x5   : > { %s132_s26 = ssub.s32 %s695_s21, %s756_s24  ;;  %p145_p0 = scmp.ne.s32.totalorder %s691_s20, %s687_s19 }
   0x6   : > { %p133_p1 = scmp.eq.s32.totalorder %s132_s26, 0  ;;  %p146_p2 = scmp.eq.s32.totalorder %s752_s22, 1 }
   0x7   : > { %p151_p3 = scmp.ne.s32.totalorder %s687_s19, %s683_s18  ;;  %p152_p4 = scmp.eq.s32.totalorder %s478_s23, 1 }
   0x8   : > { %s767_s27 = scalar_select %p133_p1, %s691_s20, %s135_s25  }
   0x9   : > { %p769_p5 = por %p146_p2, %p145_p0  ;;  %p773_p6 = por %p152_p4, %p151_p3 }
   0xa   : > { %p481_p7 = scmp.ge.s32.totalorder %s695_s21, 1  ;;  %p189_p8 = scmp.lt.s32.totalorder %s695_s21, 3 }
   0xc   : > { %p190_p9 = pnand %p481_p7, %p189_p8 }
   0xd   : > { %v221_v0 = vld [vmem:[%s900_s1] sm:$0xff] (!%p190_p9)  ;;  %v222_v1 = vld [vmem:[%s900_s1 + $0x8] sm:$0xff] (!%p190_p9)  ;;  %v223_v2 = vld [vmem:[%s900_s1 + $0x10] sm:$0xff] (!%p190_p9)  ;;  %v697_v3 = vmov (!%p190_p9), 0.0|0.0   ;;  %vm698_vm0 = vmmov (!%p190_p9), 0   ;;  %v699_v6 = vmov (!%p190_p9), 0.0  }
   0xe   : > { %193 = sbr.rel (%p190_p9) target bundleno = 485 (0x1e5), region = 40  ;;  %559 = vmatprep.subr.bf16.mxu0 (!%p190_p9), %v697_v3  ;;  %v560_v4 = vpack.c.bf16 (!%p190_p9), %v222_v1, %v221_v0  ;;  %v224_v5 = vld [vmem:[%s900_s1 + $0x18] sm:$0xff] (!%p190_p9)  ;;  %521 = vmatprep.mubr.msk.f32.mxu0 (!%p190_p9), %vm698_vm0, %v699_v6  ;;  %p216_p10 = scmp.lt.s32.totalorder (!%p190_p9), %s752_s22, 1  ;;  %v311_v7 = vld [vmem:[%s902_s3] sm:$0xff] (!%p190_p9)  ;;  %v312_v8 = vld [vmem:[%s902_s3 + $0x8] sm:$0xff] (!%p190_p9)  ;;  %vm232_vm1 = vcmask (!%p190_p9), 261120  }
   0xf   : > { %565 = vmatprep.subr.bf16.mxu1 (!%p190_p9), %v697_v3  ;;  %v566_v9 = vpack.c.bf16 (!%p190_p9), %v312_v8, %v311_v7  ;;  %v313_v10 = vld [vmem:[%s902_s3 + $0x10] sm:$0xff] (!%p190_p9)  ;;  %v314_v11 = vld [vmem:[%s902_s3 + $0x18] sm:$0xff] (!%p190_p9)  ;;  %556 = vmatprep.mubr.msk.f32.mxu1 (!%p190_p9), %vm698_vm0, %v699_v6  ;;  %v563_v12 = vpack.c.bf16 (!%p190_p9), %v224_v5, %v223_v2  ;;  %v315_v14 = vld [vmem:[%s902_s3 + $0x20] sm:$0xff] (!%p190_p9)  ;;  %s213_s26 = sand.u32 (!%p190_p9), 1, %s687_s19   ;;  %s488_s8 = sshll.u32 (!%p190_p9), %s752_s22, 7 }
  0x10   : > { %561 = vmatpush3.bf16.msra.mxu0 (!%p190_p9), %v560_v4  ;;  %v569_v13 = vpack.c.bf16 (!%p190_p9), %v314_v11, %v313_v10  ;;  %v316_v15 = vld [vmem:[%s902_s3 + $0x28] sm:$0xff] (!%p190_p9)  ;;  %v317_v18 = vld [vmem:[%s902_s3 + $0x30] sm:$0xff] (!%p190_p9)  ;;  %v318_v19 = vld [vmem:[%s902_s3 + $0x38] sm:$0xff] (!%p190_p9)  ;;  %s406_s14 = scalar_lea.sflag (!%p190_p9), [#allocation3], %s213_s26 }
  0x11   : > { %562 = vmatprep.subr.bf16.mxu0 (!%p190_p9), %v697_v3  ;;  %567 = vmatpush3.bf16.msra.mxu1 (!%p190_p9), %v566_v9  ;;  %v572_v17 = vpack.c.bf16 (!%p190_p9), %v316_v15, %v315_v14  ;;  %v575_v20 = vpack.c.bf16 (!%p190_p9), %v318_v19, %v317_v18  ;;  %v319_v21 = vld [vmem:[%s902_s3 + $0x40] sm:$0xff] (!%p190_p9)  ;;  %v320_v22 = vld [vmem:[%s902_s3 + $0x48] sm:$0xff] (!%p190_p9)  ;;  %v321_v24 = vld [vmem:[%s902_s3 + $0x50] sm:$0xff] (!%p190_p9) }
  0x12   : > { %568 = vmatprep.subr.bf16.mxu1 (!%p190_p9), %v697_v3  ;;  %v578_v23 = vpack.c.bf16 (!%p190_p9), %v320_v22, %v319_v21  ;;  %v322_v25 = vld [vmem:[%s902_s3 + $0x58] sm:$0xff] (!%p190_p9)  ;;  %v323_v27 = vld [vmem:[%s902_s3 + $0x60] sm:$0xff] (!%p190_p9)  ;;  %v324_v28 = vld [vmem:[%s902_s3 + $0x68] sm:$0xff] (!%p190_p9) }
  0x13   : > { %v581_v26 = vpack.c.bf16 (!%p190_p9), %v322_v25, %v321_v24  ;;  %v584_v29 = vpack.c.bf16 (!%p190_p9), %v324_v28, %v323_v27  ;;  %v325_v30 = vld [vmem:[%s902_s3 + $0x70] sm:$0xff] (!%p190_p9)  ;;  %v326_v31 = vld [vmem:[%s902_s3 + $0x78] sm:$0xff] (!%p190_p9)  ;;  %v484_v33 = vld [vmem:[%s901_s2] ss:$0 sm:$0xff] (!%p190_p9) }
  0x14   : > { %564 = vmatpush3.bf16.msra.mxu0 (!%p190_p9), %v563_v12  ;;  %v587_v32 = vpack.c.bf16 (!%p190_p9), %v326_v31, %v325_v30  ;;  %v486_v42 = vld [vmem:[%s903_s4] ss:$0 sm:$0xff] (!%p190_p9) }
  0x15   : > { %s217_s30 = scalar_select %p216_p10, %s752_s22, 1  ;;  %570 = vmatpush3.bf16.msra.mxu1 %v569_v13 }
  0x16   : > { %571 = vmatprep.subr.bf16.mxu1 %v697_v3  ;;  %s700_s22 = smov [#allocation2]  }
  0x17   : > { %s483_s6 = sshll.u32 %s217_s30, 3  ;;  %s482_s30 = sshll.u32 %s213_s26, 3 }
  0x18   : > { %s219_s13 = scalar_lea.vmem %s899_s0, %s483_s6  ;;  %s215_s9 = scalar_lea.vmem [#allocation2], %s482_s30 }
  0x19   : > { %v220_v16 = vld [vmem:[%s219_s13] sm:$0xff]  ;;  %573 = vmatpush3.bf16.msra.mxu1 %v572_v17  ;;  %s419_s10 = sshll.u32 %s215_s9, 4  ;;  %s856_s13 = scalar_lea.hbm %s904_s5, %s488_s8  ;;  %s858_s10 = int_to_ptr.vmem [resolvable:$true] %s419_s10 }
  0x1a   : > { %522 = vmatmul.mubr.msk.f32.vlgmr.msra.gmra.mrb[0].mxu0 %vm232_vm1, %v220_v16  ;;  %574 = vmatprep.subr.bf16.mxu1 %v697_v3  ;;  %s633_s15 = scalar_lea.vmem %s858_s10, 128  ;;  %s637_s16 = sshll.u32 %s700_s22, 4  ;;  %s638_s16 = int_to_ptr.vmem [resolvable:$false] %s637_s16 }
  0x1b   : > { %p634_p11 = scmp.ne.s32.totalorder %s858_s10, %s633_s15  ;;  %s639_s17 = scalar_lea.vmem %s638_s16, 256 }
  0x1c   : > { %p640_p0 = scmp.lt.s32.totalorder %s858_s10, %s638_s16  ;;  %p641_p1 = scmp.lt.s32.totalorder %s639_s17, %s633_s15 }
  0x1d   : > { %576 = vmatpush3.bf16.msra.mxu1 %v575_v20  ;;  %p635_p12 = pnand %p634_p11, %p769_p5 }
  0x1e   : > { %577 = vmatprep.subr.bf16.mxu1 %v697_v3  ;;  %p642_p2 = por %p641_p1, %p640_p0 }
  0x1f   : > { %p636_p13 = pneg %p635_p12 }
  0x21   : > { %579 = vmatpush3.bf16.msra.mxu1 %v578_v23  ;;  %p643_p3 = pnand %p642_p2, %p636_p13 }
  0x22   : > { %580 = vmatprep.subr.bf16.mxu1 %v697_v3 }
  0x25   : > { %582 = vmatpush3.bf16.msra.mxu1 %v581_v26 }
  0x26   : > { %583 = vmatprep.subr.bf16.mxu1 %v697_v3 }
  0x29   : > { %585 = vmatpush3.bf16.msra.mxu1 %v584_v29 }
  0x2a   : > { %586 = vmatprep.subr.bf16.mxu1 %v697_v3 }
  0x2d   : > { %588 = vmatpush3.bf16.msra.mxu1 %v587_v32 }
  0xed   : > { %v302_v34 = vpop.f32.mrb[0].mxu0 }
  0xee   : > { %v303_v35 = vadd.f32 %v484_v33, %v302_v34  ;;  %v523_v36 = vpop.f32.mrb[1].mxu0 }
  0xf0   : > { %v307_v37 = vmul.f32 0.70710677, %v303_v35  ;;  %v306_v39 = vmul.f32 0.5, %v303_v35 }
  0xf2   : > { %631 = verf.f32 %v307_v37 }
  0xfc   : > { %v632_v38 = vpop.eup %631 }
  0xfd   : > { %v309_v40 = vadd.f32 1.0, %v632_v38 }
  0xff   : > { %v310_v41 = vmul.f32 %v309_v40, %v306_v39 }
 0x101   : > { %557 = vmatmul.mubr.f32.vlgmr.msra.gmra.mrb[0].mxu1 %v310_v41 }
 0x1d4   : > { %v400_v43 = vpop.f32.mrb[0].mxu1 }
 0x1d5   : > { %v401_v44 = vadd.f32 %v486_v42, %v400_v43  ;;  %v558_v45 = vpop.f32.mrb[1].mxu1 }
 0x1d7   : > { %404 = vst.msk [vmem:[%s215_s9] sm:$0xff] %vm232_vm1, %v401_v44 }
 0x1d8   : > { %646 = shalt.err (!%p643_p3)
}
 0x1d9   : > { %s647_s23 = scalar_lea.hbm %s856_s13, 128  ;;  %s651_s30 = scalar_lea.hbm %s904_s5, 256 }
 0x1da   : > { %p648_p4 = scmp.ne.s32.totalorder %s856_s13, %s647_s23  ;;  %p652_p9 = scmp.lt.u32.totalorder %s856_s13, %s904_s5 }
 0x1db   : > { %p653_p10 = scmp.lt.u32.totalorder %s651_s30, %s647_s23  ;;  %p655_p12 = scmp.lt.u32.totalorder %s647_s23, %s856_s13 }
 0x1dc   : > { %p649_p7 = pnand %p648_p4, %p769_p5 }
 0x1dd   : > { %p654_p11 = por %p653_p10, %p652_p9 }
 0x1de   : > { %p650_p8 = pneg %p649_p7 }
 0x1df   : > { %p656_p13 = por %p655_p12, %p654_p11 }
 0x1e1   : > { %p657_p0 = pnand %p656_p13, %p650_p8 }
 0x1e3   : > { %660 = shalt.err (!%p657_p0)
}
 0x1e4   : > { %589 = dma.vmem_to_hbm [thread:$0]  (%p769_p5), %s858_s10, 128, %s856_s13, %s406_s14  }
 0x1e5 PF: > { %p595_p1 = scmp.ge.s32.totalorder %s695_s21, 2  ;;  %s431_s8 = sand.u32 1, %s683_s18  }
 0x1e6   : > { %s432_s9 = scalar_lea.sflag [#allocation3], %s431_s8 }
 0x1e7   : > { %p592_p2 = pnand %p595_p1, %p773_p6 }
 0x1e9   : > { %678 = dma.done.wait (!%p592_p2), %s432_s9, 128  }
 0x1ea   : > { %680 = vsyncadd (!%p592_p2), %s432_s9, 4294967168  ;;  %p15_p3 = scmp.ge.s32.totalorder %s756_s24, 4   ;;  %s907_s18 = smov %s687_s19 }
 0x1eb   : > { %s908_s19 = smov %s691_s20  ;;  %s909_s20 = smov %s767_s27 }
 0x1ec   : > { %s910_s21 = smov %s756_s24  ;;  %17 = sbr.rel (!%p15_p3) target bundleno = 3 (0x3), region = 75 }
 0x1f3   :  { %437 = vsyncpa [#allocation3], 1 }
 0x1f4   :  { %439 = vsyncpa [#allocation3 + $0x1], 1 }

</bundles_post_ra>
